<compile_context>
chip_gen: v5e
topology: v5e:2x2
jax: 0.10.0
libtpu: 0.0.40
codegen_flags: <defaults>
</compile_context>

<pallas_src>
import functools

import jax
import jax.numpy as jnp
from jax import lax
from jax.experimental import pallas as pl
from jax.experimental.pallas import tpu as pltpu


def _conv_tile(x, w_ref, L):
    """Conv1d ('same', stride 1, no bias) on one batch tile.

    x:     (blk_n, Cin, L_pad) f32; L_pad is a multiple of 128 and columns
           >= L are zero padding.
    w_ref: (K, Cin, Cout, 1) VMEM ref with w_ref[k, ci, co, 0] == w_torch[co, ci, k].
    Returns (blk_n, Cout, L_pad) f32 with columns >= L forced to zero.
    """
    blk_n, cin, L_pad = x.shape
    K, _, cout, _ = w_ref.shape
    pad = (K - 1) // 2

    lane = lax.broadcasted_iota(jnp.int32, (1, 1, L_pad), 2)

    # Shifted copies of x, one per tap: xs_k[..., i] = x[..., i + (k - pad)],
    # zero outside [0, L).  pltpu.roll runs on the XLU and co-issues with the
    # VPU FMAs below; wrap-around lanes are masked off.
    shifted = []
    for k in range(K):
        d = k - pad
        if d == 0:
            xs = x
        elif d < 0:
            xs = pltpu.roll(x, -d, axis=2)
            xs = jnp.where(lane < -d, 0.0, xs)
        else:
            xs = pltpu.roll(x, L_pad - d, axis=2)
            xs = jnp.where(lane >= L - d, 0.0, xs)
        shifted.append(xs)

    # Tiny channel counts: K*Cin broadcast multiply-accumulates on the VPU.
    # (weights arrive as (Cout, 1) columns -> sublane-aligned broadcast, no
    #  cross-lane relayout).  For large channel counts use the MXU instead.
    acc = jnp.zeros((blk_n, cout, L_pad), jnp.float32)
    for k in range(K):
        xs = shifted[k]
        for ci in range(cin):
            w_vec = w_ref[k, ci].astype(jnp.float32)          # (Cout, 1)
            acc = acc + w_vec[None, :, :] * xs[:, ci:ci + 1, :]

    # Zero padded columns so they never pollute statistics or the output.
    return jnp.where(lane < L, acc, 0.0)


def _conv_stats_kernel(x_ref, w_ref, sum_ref, sq_ref, *, L):
    """Pass 1: conv on this batch tile + per-channel sum / sum-of-squares."""
    x = x_ref[...].astype(jnp.float32)
    acc = _conv_tile(x, w_ref, L)                              # (blk_n, Cout, L_pad)
    cout = acc.shape[1]
    sum_ref[...] = jnp.sum(acc, axis=(0, 2)).reshape(1, 1, cout)
    sq_ref[...] = jnp.sum(acc * acc, axis=(0, 2)).reshape(1, 1, cout)


def _conv_bn_relu_kernel(x_ref, w_ref, scale_ref, shift_ref, o_ref, *, L):
    """Pass 2: recompute conv, apply fused BN affine + ReLU, lane-dense store."""
    x = x_ref[...].astype(jnp.float32)
    acc = _conv_tile(x, w_ref, L)                              # (blk_n, Cout, L_pad)
    scale = scale_ref[...][None, :, :]                         # (1, Cout, 1)
    shift = shift_ref[...][None, :, :]
    y = jnp.maximum(acc * scale + shift, 0.0)
    o_ref[...] = y.astype(o_ref.dtype)


def _pick_block_n(n, cin, cout, l_pad, budget_bytes=4 * 1024 * 1024):
    """Largest divisor of n whose per-step footprint fits the VMEM budget,
    keeping >= 2 grid steps when n > 1 (pipelining / v7x megacore)."""
    per_sample = (cin + 2 * cout) * l_pad * 4 * 2   # x + out + acc, ~double buffered
    cap = max(1, budget_bytes // per_sample)
    best = 1
    for d in range(1, n + 1):
        if n % d == 0 and d <= cap:
            best = d
    if best == n and n > 1:
        for d in range(n - 1, 0, -1):
            if n % d == 0:
                best = d
                break
    return best


def my_conv_forward(x, w, gamma, beta, eps=1e-5):
    """x: (N, Cin, L); w: (Cout, Cin, K); gamma/beta: (Cout,).
    Returns (N, Cout, L): Conv1d(stride 1, 'same', no bias) -> BatchNorm1d
    (training-mode batch stats) -> ReLU, matching PyTorch `myConv.forward`."""
    N, Cin, L = x.shape
    Cout, _, K = w.shape

    # Lane-align the sequence axis (free when L is already a multiple of 128).
    L_pad = max(128, ((L + 127) // 128) * 128)
    x_p = x if L_pad == L else jnp.pad(x, ((0, 0), (0, 0), (0, L_pad - L)))

    # (Cout, Cin, K) -> (K, Cin, Cout, 1): tiny array; puts Cout on sublanes so
    # the in-kernel weight broadcast needs no cross-lane relayout.
    w_r = jnp.transpose(w, (2, 1, 0))[..., None].astype(jnp.float32)

    blk_n = _pick_block_n(N, Cin, Cout, L_pad)
    grid_n = N // blk_n

    x_spec = pl.BlockSpec((blk_n, Cin, L_pad), lambda n: (n, 0, 0))
    w_spec = pl.BlockSpec((K, Cin, Cout, 1), lambda n: (0, 0, 0, 0))
    cparams = pltpu.CompilerParams(
        dimension_semantics=("parallel",),
        vmem_limit_bytes=32 * 1024 * 1024)

    conv_flops = 2 * N * L_pad * Cout * Cin * K
    x_bytes = N * Cin * L_pad * 4

    # ---- Pass 1: conv + per-tile per-channel sum / sum-of-squares ----------
    sums, sqs = pl.pallas_call(
        functools.partial(_conv_stats_kernel, L=L),
        out_shape=(jax.ShapeDtypeStruct((grid_n, 1, Cout), jnp.float32),
                   jax.ShapeDtypeStruct((grid_n, 1, Cout), jnp.float32)),
        grid=(grid_n,),
        in_specs=[x_spec, w_spec],
        out_specs=(pl.BlockSpec((1, 1, Cout), lambda n: (n, 0, 0)),
                   pl.BlockSpec((1, 1, Cout), lambda n: (n, 0, 0))),
        compiler_params=cparams,
        cost_estimate=pl.CostEstimate(
            flops=conv_flops + 4 * N * L_pad * Cout,
            transcendentals=0,
            bytes_accessed=x_bytes + 2 * grid_n * Cout * 4 + w_r.size * 4),
    )(x_p, w_r)

    # ---- Tiny XLA epilogue: global batch stats -> fused per-channel affine --
    count = jnp.float32(N * L)
    mean = jnp.sum(sums, axis=(0, 1)) / count                       # (Cout,)
    var = jnp.maximum(jnp.sum(sqs, axis=(0, 1)) / count - mean * mean, 0.0)
    scale = gamma.astype(jnp.float32) * lax.rsqrt(var + eps)        # (Cout,)
    shift = beta.astype(jnp.float32) - mean * scale

    # ---- Pass 2: recompute conv, fused scale/shift + ReLU, lane-dense out ---
    out_p = pl.pallas_call(
        functools.partial(_conv_bn_relu_kernel, L=L),
        out_shape=jax.ShapeDtypeStruct((N, Cout, L_pad), x.dtype),
        grid=(grid_n,),
        in_specs=[x_spec, w_spec,
                  pl.BlockSpec((Cout, 1), lambda n: (0, 0)),
                  pl.BlockSpec((Cout, 1), lambda n: (0, 0))],
        out_specs=pl.BlockSpec((blk_n, Cout, L_pad), lambda n: (n, 0, 0)),
        compiler_params=cparams,
        cost_estimate=pl.CostEstimate(
            flops=conv_flops + 3 * N * L_pad * Cout,
            transcendentals=0,
            bytes_accessed=x_bytes + N * Cout * L_pad * x.dtype.itemsize),
    )(x_p, w_r, scale[:, None], shift[:, None])

    return out_p if L_pad == L else out_p[:, :, :L]


def _reference(x, w, gamma, beta, eps=1e-5):
    """Pure-JAX reference matching the PyTorch forward semantics."""
    K = w.shape[-1]
    pad = (K - 1) // 2
    y = lax.conv_general_dilated(
        x, w, window_strides=(1,), padding=[(pad, pad)],
        dimension_numbers=("NCH", "OIH", "NCH"))
    mean = jnp.mean(y, axis=(0, 2), keepdims=True)
    var = jnp.mean((y - mean) ** 2, axis=(0, 2), keepdims=True)
    y = (y - mean) * lax.rsqrt(var + eps)
    y = y * gamma[None, :, None] + beta[None, :, None]
    return jnp.maximum(y, 0.0)


if __name__ == "__main__":
    # Shapes consistent with myConv: batch=2, in_size=4, out_size=8, seq=16, k=3.
    N, C_IN, C_OUT, L, K = 2, 4, 8, 16, 3

    key = jax.random.PRNGKey(0)
    kx, kw, kg, kb = jax.random.split(key, 4)
    x = jax.random.normal(kx, (N, C_IN, L), dtype=jnp.float32)
    bound = 1.0 / (C_IN * K) ** 0.5
    w = jax.random.uniform(kw, (C_OUT, C_IN, K), minval=-bound, maxval=bound,
                           dtype=jnp.float32)
    gamma = 1.0 + 0.1 * jax.random.normal(kg, (C_OUT,), dtype=jnp.float32)
    beta = 0.1 * jax.random.normal(kb, (C_OUT,), dtype=jnp.float32)

    out = jax.block_until_ready(my_conv_forward(x, w, gamma, beta))
    ref = jax.block_until_ready(_reference(x, w, gamma, beta))

    assert out.shape == (N, C_OUT, L)
    assert jnp.allclose(out, ref, atol=1e-4, rtol=1e-4), "mismatch vs reference"
    print("KERNEL_OK")
</pallas_src>

<mosaic_0001>
module attributes {stable_mosaic.version = 11 : i64} {
  func.func @_conv_stats_kernel(%arg0: i32, %arg1: memref<1x4x128xf32, #tpu.memory_space<vmem>>, %arg2: memref<3x4x8x1xf32, #tpu.memory_space<vmem>>, %arg3: memref<1x1x8xf32, #tpu.memory_space<vmem>>, %arg4: memref<1x1x8xf32, #tpu.memory_space<vmem>>) attributes {dimension_semantics = [#tpu.dimension_semantics<parallel>], iteration_bounds = array<i64: 2>, scalar_prefetch = 0 : i64, scratch_operands = 0 : i64, tpu.core_type = #tpu.core_type<tc>, window_params = [{transform_indices = @transform_0, window_bounds = array<i64: 1, 4, 128>}, {pipeline_mode = #tpu.pipeline_mode<synchronous>, transform_indices = @transform_1, window_bounds = array<i64: 3, 4, 8, 1>}, {transform_indices = @transform_2, window_bounds = array<i64: 1, 1, 8>}, {transform_indices = @transform_3, window_bounds = array<i64: 1, 1, 8>}]} {
    %c0 = arith.constant 0 : index
    %c0_0 = arith.constant 0 : index
    %c0_1 = arith.constant 0 : index
    %0 = vector.load %arg1[%c0, %c0_0, %c0_1] : memref<1x4x128xf32, #tpu.memory_space<vmem>>, vector<1x4x128xf32>
    %1 = tpu.iota {dimensions = array<i32: 2>} : vector<1x1x128xi32>
    %c1_i32 = arith.constant 1 : i32
    %2 = tpu.dynamic_rotate %0 by %c1_i32 dim 2 : vector<1x4x128xf32>, i32 -> vector<1x4x128xf32>
    %c1_i32_2 = arith.constant 1 : i32
    %3 = vector.broadcast %c1_i32_2 : i32 to vector<1x1x128xi32>
    %4 = arith.cmpi slt, %1, %3 : vector<1x1x128xi32>
    %cst = arith.constant 0.000000e+00 : f32
    %5 = vector.shape_cast %4 : vector<1x1x128xi1> to vector<1x1x128xi1>
    %6 = vector.broadcast %5 : vector<1x1x128xi1> to vector<1x4x128xi1>
    %7 = vector.broadcast %cst : f32 to vector<1x4x128xf32>
    %8 = arith.select %6, %7, %2 : vector<1x4x128xi1>, vector<1x4x128xf32>
    %c127_i32 = arith.constant 127 : i32
    %9 = tpu.dynamic_rotate %0 by %c127_i32 dim 2 : vector<1x4x128xf32>, i32 -> vector<1x4x128xf32>
    %c15_i32 = arith.constant 15 : i32
    %10 = vector.broadcast %c15_i32 : i32 to vector<1x1x128xi32>
    %11 = arith.cmpi sge, %1, %10 : vector<1x1x128xi32>
    %cst_3 = arith.constant 0.000000e+00 : f32
    %12 = vector.shape_cast %11 : vector<1x1x128xi1> to vector<1x1x128xi1>
    %13 = vector.broadcast %12 : vector<1x1x128xi1> to vector<1x4x128xi1>
    %14 = vector.broadcast %cst_3 : f32 to vector<1x4x128xf32>
    %15 = arith.select %13, %14, %9 : vector<1x4x128xi1>, vector<1x4x128xf32>
    %cst_4 = arith.constant 0.000000e+00 : f32
    %16 = vector.broadcast %cst_4 : f32 to vector<1x8x128xf32>
    %c0_5 = arith.constant 0 : index
    %c0_6 = arith.constant 0 : index
    %c0_7 = arith.constant 0 : index
    %c0_8 = arith.constant 0 : index
    %17 = vector.load %arg2[%c0_5, %c0_6, %c0_7, %c0_8] : memref<3x4x8x1xf32, #tpu.memory_space<vmem>>, vector<1x1x8x1xf32>
    %18 = vector.shape_cast %17 : vector<1x1x8x1xf32> to vector<8x1xf32>
    %19 = vector.shape_cast %18 : vector<8x1xf32> to vector<1x8x1xf32>
    %20 = vector.extract_strided_slice %8 {offsets = [0, 0, 0], sizes = [1, 1, 128], strides = [1, 1, 1]} : vector<1x4x128xf32> to vector<1x1x128xf32>
    %21 = vector.broadcast %19 : vector<1x8x1xf32> to vector<1x8x128xf32>
    %22 = vector.broadcast %20 : vector<1x1x128xf32> to vector<1x8x128xf32>
    %23 = arith.mulf %21, %22 : vector<1x8x128xf32>
    %24 = arith.addf %16, %23 : vector<1x8x128xf32>
    %c0_9 = arith.constant 0 : index
    %c1 = arith.constant 1 : index
    %c0_10 = arith.constant 0 : index
    %c0_11 = arith.constant 0 : index
    %25 = vector.load %arg2[%c0_9, %c1, %c0_10, %c0_11] : memref<3x4x8x1xf32, #tpu.memory_space<vmem>>, vector<1x1x8x1xf32>
    %26 = vector.shape_cast %25 : vector<1x1x8x1xf32> to vector<8x1xf32>
    %27 = vector.shape_cast %26 : vector<8x1xf32> to vector<1x8x1xf32>
    %28 = vector.extract_strided_slice %8 {offsets = [0, 1, 0], sizes = [1, 1, 128], strides = [1, 1, 1]} : vector<1x4x128xf32> to vector<1x1x128xf32>
    %29 = vector.broadcast %27 : vector<1x8x1xf32> to vector<1x8x128xf32>
    %30 = vector.broadcast %28 : vector<1x1x128xf32> to vector<1x8x128xf32>
    %31 = arith.mulf %29, %30 : vector<1x8x128xf32>
    %32 = arith.addf %24, %31 : vector<1x8x128xf32>
    %c0_12 = arith.constant 0 : index
    %c2 = arith.constant 2 : index
    %c0_13 = arith.constant 0 : index
    %c0_14 = arith.constant 0 : index
    %33 = vector.load %arg2[%c0_12, %c2, %c0_13, %c0_14] : memref<3x4x8x1xf32, #tpu.memory_space<vmem>>, vector<1x1x8x1xf32>
    %34 = vector.shape_cast %33 : vector<1x1x8x1xf32> to vector<8x1xf32>
    %35 = vector.shape_cast %34 : vector<8x1xf32> to vector<1x8x1xf32>
    %36 = vector.extract_strided_slice %8 {offsets = [0, 2, 0], sizes = [1, 1, 128], strides = [1, 1, 1]} : vector<1x4x128xf32> to vector<1x1x128xf32>
    %37 = vector.broadcast %35 : vector<1x8x1xf32> to vector<1x8x128xf32>
    %38 = vector.broadcast %36 : vector<1x1x128xf32> to vector<1x8x128xf32>
    %39 = arith.mulf %37, %38 : vector<1x8x128xf32>
    %40 = arith.addf %32, %39 : vector<1x8x128xf32>
    %c0_15 = arith.constant 0 : index
    %c3 = arith.constant 3 : index
    %c0_16 = arith.constant 0 : index
    %c0_17 = arith.constant 0 : index
    %41 = vector.load %arg2[%c0_15, %c3, %c0_16, %c0_17] : memref<3x4x8x1xf32, #tpu.memory_space<vmem>>, vector<1x1x8x1xf32>
    %42 = vector.shape_cast %41 : vector<1x1x8x1xf32> to vector<8x1xf32>
    %43 = vector.shape_cast %42 : vector<8x1xf32> to vector<1x8x1xf32>
    %44 = vector.extract_strided_slice %8 {offsets = [0, 3, 0], sizes = [1, 1, 128], strides = [1, 1, 1]} : vector<1x4x128xf32> to vector<1x1x128xf32>
    %45 = vector.broadcast %43 : vector<1x8x1xf32> to vector<1x8x128xf32>
    %46 = vector.broadcast %44 : vector<1x1x128xf32> to vector<1x8x128xf32>
    %47 = arith.mulf %45, %46 : vector<1x8x128xf32>
    %48 = arith.addf %40, %47 : vector<1x8x128xf32>
    %c1_18 = arith.constant 1 : index
    %c0_19 = arith.constant 0 : index
    %c0_20 = arith.constant 0 : index
    %c0_21 = arith.constant 0 : index
    %49 = vector.load %arg2[%c1_18, %c0_19, %c0_20, %c0_21] : memref<3x4x8x1xf32, #tpu.memory_space<vmem>>, vector<1x1x8x1xf32>
    %50 = vector.shape_cast %49 : vector<1x1x8x1xf32> to vector<8x1xf32>
    %51 = vector.shape_cast %50 : vector<8x1xf32> to vector<1x8x1xf32>
    %52 = vector.extract_strided_slice %0 {offsets = [0, 0, 0], sizes = [1, 1, 128], strides = [1, 1, 1]} : vector<1x4x128xf32> to vector<1x1x128xf32>
    %53 = vector.broadcast %51 : vector<1x8x1xf32> to vector<1x8x128xf32>
    %54 = vector.broadcast %52 : vector<1x1x128xf32> to vector<1x8x128xf32>
    %55 = arith.mulf %53, %54 : vector<1x8x128xf32>
    %56 = arith.addf %48, %55 : vector<1x8x128xf32>
    %c1_22 = arith.constant 1 : index
    %c1_23 = arith.constant 1 : index
    %c0_24 = arith.constant 0 : index
    %c0_25 = arith.constant 0 : index
    %57 = vector.load %arg2[%c1_22, %c1_23, %c0_24, %c0_25] : memref<3x4x8x1xf32, #tpu.memory_space<vmem>>, vector<1x1x8x1xf32>
    %58 = vector.shape_cast %57 : vector<1x1x8x1xf32> to vector<8x1xf32>
    %59 = vector.shape_cast %58 : vector<8x1xf32> to vector<1x8x1xf32>
    %60 = vector.extract_strided_slice %0 {offsets = [0, 1, 0], sizes = [1, 1, 128], strides = [1, 1, 1]} : vector<1x4x128xf32> to vector<1x1x128xf32>
    %61 = vector.broadcast %59 : vector<1x8x1xf32> to vector<1x8x128xf32>
    %62 = vector.broadcast %60 : vector<1x1x128xf32> to vector<1x8x128xf32>
    %63 = arith.mulf %61, %62 : vector<1x8x128xf32>
    %64 = arith.addf %56, %63 : vector<1x8x128xf32>
    %c1_26 = arith.constant 1 : index
    %c2_27 = arith.constant 2 : index
    %c0_28 = arith.constant 0 : index
    %c0_29 = arith.constant 0 : index
    %65 = vector.load %arg2[%c1_26, %c2_27, %c0_28, %c0_29] : memref<3x4x8x1xf32, #tpu.memory_space<vmem>>, vector<1x1x8x1xf32>
    %66 = vector.shape_cast %65 : vector<1x1x8x1xf32> to vector<8x1xf32>
    %67 = vector.shape_cast %66 : vector<8x1xf32> to vector<1x8x1xf32>
    %68 = vector.extract_strided_slice %0 {offsets = [0, 2, 0], sizes = [1, 1, 128], strides = [1, 1, 1]} : vector<1x4x128xf32> to vector<1x1x128xf32>
    %69 = vector.broadcast %67 : vector<1x8x1xf32> to vector<1x8x128xf32>
    %70 = vector.broadcast %68 : vector<1x1x128xf32> to vector<1x8x128xf32>
    %71 = arith.mulf %69, %70 : vector<1x8x128xf32>
    %72 = arith.addf %64, %71 : vector<1x8x128xf32>
    %c1_30 = arith.constant 1 : index
    %c3_31 = arith.constant 3 : index
    %c0_32 = arith.constant 0 : index
    %c0_33 = arith.constant 0 : index
    %73 = vector.load %arg2[%c1_30, %c3_31, %c0_32, %c0_33] : memref<3x4x8x1xf32, #tpu.memory_space<vmem>>, vector<1x1x8x1xf32>
    %74 = vector.shape_cast %73 : vector<1x1x8x1xf32> to vector<8x1xf32>
    %75 = vector.shape_cast %74 : vector<8x1xf32> to vector<1x8x1xf32>
    %76 = vector.extract_strided_slice %0 {offsets = [0, 3, 0], sizes = [1, 1, 128], strides = [1, 1, 1]} : vector<1x4x128xf32> to vector<1x1x128xf32>
    %77 = vector.broadcast %75 : vector<1x8x1xf32> to vector<1x8x128xf32>
    %78 = vector.broadcast %76 : vector<1x1x128xf32> to vector<1x8x128xf32>
    %79 = arith.mulf %77, %78 : vector<1x8x128xf32>
    %80 = arith.addf %72, %79 : vector<1x8x128xf32>
    %c2_34 = arith.constant 2 : index
    %c0_35 = arith.constant 0 : index
    %c0_36 = arith.constant 0 : index
    %c0_37 = arith.constant 0 : index
    %81 = vector.load %arg2[%c2_34, %c0_35, %c0_36, %c0_37] : memref<3x4x8x1xf32, #tpu.memory_space<vmem>>, vector<1x1x8x1xf32>
    %82 = vector.shape_cast %81 : vector<1x1x8x1xf32> to vector<8x1xf32>
    %83 = vector.shape_cast %82 : vector<8x1xf32> to vector<1x8x1xf32>
    %84 = vector.extract_strided_slice %15 {offsets = [0, 0, 0], sizes = [1, 1, 128], strides = [1, 1, 1]} : vector<1x4x128xf32> to vector<1x1x128xf32>
    %85 = vector.broadcast %83 : vector<1x8x1xf32> to vector<1x8x128xf32>
    %86 = vector.broadcast %84 : vector<1x1x128xf32> to vector<1x8x128xf32>
    %87 = arith.mulf %85, %86 : vector<1x8x128xf32>
    %88 = arith.addf %80, %87 : vector<1x8x128xf32>
    %c2_38 = arith.constant 2 : index
    %c1_39 = arith.constant 1 : index
    %c0_40 = arith.constant 0 : index
    %c0_41 = arith.constant 0 : index
    %89 = vector.load %arg2[%c2_38, %c1_39, %c0_40, %c0_41] : memref<3x4x8x1xf32, #tpu.memory_space<vmem>>, vector<1x1x8x1xf32>
    %90 = vector.shape_cast %89 : vector<1x1x8x1xf32> to vector<8x1xf32>
    %91 = vector.shape_cast %90 : vector<8x1xf32> to vector<1x8x1xf32>
    %92 = vector.extract_strided_slice %15 {offsets = [0, 1, 0], sizes = [1, 1, 128], strides = [1, 1, 1]} : vector<1x4x128xf32> to vector<1x1x128xf32>
    %93 = vector.broadcast %91 : vector<1x8x1xf32> to vector<1x8x128xf32>
    %94 = vector.broadcast %92 : vector<1x1x128xf32> to vector<1x8x128xf32>
    %95 = arith.mulf %93, %94 : vector<1x8x128xf32>
    %96 = arith.addf %88, %95 : vector<1x8x128xf32>
    %c2_42 = arith.constant 2 : index
    %c2_43 = arith.constant 2 : index
    %c0_44 = arith.constant 0 : index
    %c0_45 = arith.constant 0 : index
    %97 = vector.load %arg2[%c2_42, %c2_43, %c0_44, %c0_45] : memref<3x4x8x1xf32, #tpu.memory_space<vmem>>, vector<1x1x8x1xf32>
    %98 = vector.shape_cast %97 : vector<1x1x8x1xf32> to vector<8x1xf32>
    %99 = vector.shape_cast %98 : vector<8x1xf32> to vector<1x8x1xf32>
    %100 = vector.extract_strided_slice %15 {offsets = [0, 2, 0], sizes = [1, 1, 128], strides = [1, 1, 1]} : vector<1x4x128xf32> to vector<1x1x128xf32>
    %101 = vector.broadcast %99 : vector<1x8x1xf32> to vector<1x8x128xf32>
    %102 = vector.broadcast %100 : vector<1x1x128xf32> to vector<1x8x128xf32>
    %103 = arith.mulf %101, %102 : vector<1x8x128xf32>
    %104 = arith.addf %96, %103 : vector<1x8x128xf32>
    %c2_46 = arith.constant 2 : index
    %c3_47 = arith.constant 3 : index
    %c0_48 = arith.constant 0 : index
    %c0_49 = arith.constant 0 : index
    %105 = vector.load %arg2[%c2_46, %c3_47, %c0_48, %c0_49] : memref<3x4x8x1xf32, #tpu.memory_space<vmem>>, vector<1x1x8x1xf32>
    %106 = vector.shape_cast %105 : vector<1x1x8x1xf32> to vector<8x1xf32>
    %107 = vector.shape_cast %106 : vector<8x1xf32> to vector<1x8x1xf32>
    %108 = vector.extract_strided_slice %15 {offsets = [0, 3, 0], sizes = [1, 1, 128], strides = [1, 1, 1]} : vector<1x4x128xf32> to vector<1x1x128xf32>
    %109 = vector.broadcast %107 : vector<1x8x1xf32> to vector<1x8x128xf32>
    %110 = vector.broadcast %108 : vector<1x1x128xf32> to vector<1x8x128xf32>
    %111 = arith.mulf %109, %110 : vector<1x8x128xf32>
    %112 = arith.addf %104, %111 : vector<1x8x128xf32>
    %c16_i32 = arith.constant 16 : i32
    %113 = vector.broadcast %c16_i32 : i32 to vector<1x1x128xi32>
    %114 = arith.cmpi slt, %1, %113 : vector<1x1x128xi32>
    %cst_50 = arith.constant 0.000000e+00 : f32
    %115 = vector.shape_cast %114 : vector<1x1x128xi1> to vector<1x1x128xi1>
    %116 = vector.broadcast %115 : vector<1x1x128xi1> to vector<1x8x128xi1>
    %117 = vector.broadcast %cst_50 : f32 to vector<1x8x128xf32>
    %118 = arith.select %116, %112, %117 : vector<1x8x128xi1>, vector<1x8x128xf32>
    %cst_51 = arith.constant dense<0.000000e+00> : vector<8xf32>
    %119 = vector.multi_reduction <add>, %118, %cst_51 [0, 2] : vector<1x8x128xf32> to vector<8xf32>
    %120 = vector.shape_cast %119 : vector<8xf32> to vector<1x1x8xf32>
    %c0_52 = arith.constant 0 : index
    %c0_53 = arith.constant 0 : index
    %c0_54 = arith.constant 0 : index
    %121 = vector.load %arg3[%c0_52, %c0_53, %c0_54] : memref<1x1x8xf32, #tpu.memory_space<vmem>>, vector<1x1x8xf32>
    tpu.vector_store %arg3[%c0_52, %c0_53, %c0_54], %120 {strides = array<i32>} : memref<1x1x8xf32, #tpu.memory_space<vmem>>, vector<1x1x8xf32>,
    %122 = arith.mulf %118, %118 : vector<1x8x128xf32>
    %cst_55 = arith.constant dense<0.000000e+00> : vector<8xf32>
    %123 = vector.multi_reduction <add>, %122, %cst_55 [0, 2] : vector<1x8x128xf32> to vector<8xf32>
    %124 = vector.shape_cast %123 : vector<8xf32> to vector<1x1x8xf32>
    %c0_56 = arith.constant 0 : index
    %c0_57 = arith.constant 0 : index
    %c0_58 = arith.constant 0 : index
    %125 = vector.load %arg4[%c0_56, %c0_57, %c0_58] : memref<1x1x8xf32, #tpu.memory_space<vmem>>, vector<1x1x8xf32>
    tpu.vector_store %arg4[%c0_56, %c0_57, %c0_58], %124 {strides = array<i32>} : memref<1x1x8xf32, #tpu.memory_space<vmem>>, vector<1x1x8xf32>,
    return
  }
  func.func @transform_0(%arg0: i32) -> (i32, i32, i32) {
    %c0_i32 = arith.constant 0 : i32
    %c0_i32_0 = arith.constant 0 : i32
    %c0_i32_1 = arith.constant 0 : i32
    return %arg0, %c0_i32, %c0_i32_0 : i32, i32, i32
  }
  func.func @transform_1(%arg0: i32) -> (i32, i32, i32, i32) {
    %c0_i32 = arith.constant 0 : i32
    %c0_i32_0 = arith.constant 0 : i32
    %c0_i32_1 = arith.constant 0 : i32
    %c0_i32_2 = arith.constant 0 : i32
    %c0_i32_3 = arith.constant 0 : i32
    return %c0_i32, %c0_i32_0, %c0_i32_1, %c0_i32_2 : i32, i32, i32, i32
  }
  func.func @transform_2(%arg0: i32) -> (i32, i32, i32) {
    %c0_i32 = arith.constant 0 : i32
    %c0_i32_0 = arith.constant 0 : i32
    %c0_i32_1 = arith.constant 0 : i32
    return %arg0, %c0_i32, %c0_i32_0 : i32, i32, i32
  }
  func.func @transform_3(%arg0: i32) -> (i32, i32, i32) {
    %c0_i32 = arith.constant 0 : i32
    %c0_i32_0 = arith.constant 0 : i32
    %c0_i32_1 = arith.constant 0 : i32
    return %arg0, %c0_i32, %c0_i32_0 : i32, i32, i32
  }
}

</mosaic_0001>

<bundles_post_ra>
// kernel: tpu_custom_call.1
= control target key start
LH: loop header
LB: loop body
LE: loop exit
PB: predicated region body
PF: predicated region fallthrough
CT: control target
= control target key end

     0   :  { %9 = vsyncpa [#allocation3], 0  ;;  %s803_s0 = inlined_call_operand.vmem [shape: f32[2,4,128], index: 0, kind: input, shape index: {}]   ;;  %s804_s1 = inlined_call_operand.vmem [shape: f32[3,4,8,1], index: 1, kind: input, shape index: {}]   ;;  %s805_s2 = inlined_call_operand.hbm [shape: f32[2,1,8], index: 2, kind: output, shape index: {0}]   ;;  %s806_s3 = inlined_call_operand.hbm [shape: f32[2,1,8], index: 3, kind: output, shape index: {1}]  }
   0x1   :  { %11 = vsyncpa [#allocation3 + $0x1], 0 }
   0x2   :  { %12 = vsyncpa [#allocation5], 0 }
   0x3   :  { %14 = vsyncpa [#allocation5 + $0x1], 0  ;;  %s627_s12 = smov 0   ;;  %s629_s13 = smov 0  }
   0x4   :  { %s631_s14 = smov 0   ;;  %s633_s15 = smov 0  }
   0x5 LB: > { %s648_s16 = sadd.s32 4294967295, %s602_s15   ;;  %s440_s17 = sadd.s32 4294967294, %s602_s15   ;;  %s602_s15 = sphi %s633_s15, %s812_s15   ;;  %s598_s14 = sphi %s631_s14, %s811_s14   ;;  %s594_s13 = sphi %s629_s13, %s810_s13   ;;  %s590_s12 = sphi %s627_s12, %s809_s12  }
   0x6   : > { %s652_s18 = sadd.s32 1, %s602_s15   ;;  %s74_s19 = sadd.s32 1, %s598_s14 }
   0x7   : > { %s71_s20 = ssub.s32 %s602_s15, %s652_s18  ;;  %p84_p0 = scmp.ne.s32.totalorder %s598_s14, %s594_s13 }
   0x8   : > { %p72_p1 = scmp.eq.s32.totalorder %s71_s20, 0  ;;  %p85_p2 = scmp.eq.s32.totalorder %s648_s16, 1 }
   0x9   : > { %p90_p3 = scmp.ne.s32.totalorder %s594_s13, %s590_s12  ;;  %p91_p4 = scmp.eq.s32.totalorder %s440_s17, 1 }
   0xa   : > { %s663_s21 = scalar_select %p72_p1, %s598_s14, %s74_s19  }
   0xb   : > { %p665_p5 = por %p85_p2, %p84_p0  ;;  %p669_p6 = por %p91_p4, %p90_p3 }
   0xc   : > { %p443_p7 = scmp.ge.s32.totalorder %s602_s15, 1  ;;  %p145_p8 = scmp.lt.s32.totalorder %s602_s15, 3 }
   0xe   : > { %p146_p9 = pnand %p443_p7, %p145_p8 }
   0xf   : > { %p171_p10 = scmp.lt.s32.totalorder (!%p146_p9), %s648_s16, 1  ;;  %s605_s6 = smov (!%p146_p9), 1  }
  0x10   : > { %149 = sbr.rel (%p146_p9) target bundleno = 310 (0x136), region = 28  ;;  %s606_s26 = smov (!%p146_p9), 127  }
  0x11   : > { %s730_s10 = sand.u32 (!%p146_p9), 1, %s594_s13   ;;  %s340_s19 = scalar_lea.hbm (!%p146_p9), %s805_s2, %s648_s16 }
  0x12   : > { %s353_s25 = scalar_lea.hbm (!%p146_p9), %s806_s3, %s648_s16  ;;  %s528_s9 = scalar_lea.hbm (!%p146_p9), %s805_s2, 2 }
  0x13   : > { %s748_s4 = sshll.u32 (!%p146_p9), %s353_s25, 4  ;;  %s358_s4 = int_to_ptr.hbm [resolvable:$true] %s748_s4 }
  0x15   : > { %v447_v0 = vld [vmem:[%s804_s1 + $0x18] sm:$0xff]  ;;  %v445_v1 = vld [vmem:[%s804_s1 + $0x8] sm:$0xff]  ;;  %v604_v2 = vmov 0   ;;  %s172_s28 = scalar_select %p171_p10, %s648_s16, 1  ;;  %v448_v4 = vld [vmem:[%s804_s1 + $0x20] sm:$0xff]  ;;  %v176_v15 = vlaneseq  ;;  %vm318_vm3 = vcmask 57344  }
  0x16   : > { %507 = vset.pattern.permute.xlu2 %v604_v2  ;;  %506 = vset.pattern.permute.xlu1 %v604_v2  ;;  %v446_v5 = vld [vmem:[%s804_s1 + $0x10] sm:$0xff]  ;;  %v190_v6 = vld [vmem:[%s804_s1] sm:$0xff]  ;;  %v449_v8 = vld [vmem:[%s804_s1 + $0x28] sm:$0xff]  ;;  %s328_s16 = scalar_lea.sflag [#allocation3], %s730_s10 }
  0x17   : > { %223 = vperm.xlu2 %507, %v447_v0   ;;  %203 = vperm.xlu1 %506, %v445_v1   ;;  %s444_s29 = sshll.u32 %s172_s28, 2  ;;  %v450_v7 = vld [vmem:[%s804_s1 + $0x30] sm:$0xff]  ;;  %v452_v9 = vld [vmem:[%s804_s1 + $0x40] sm:$0xff]  ;;  %v451_v10 = vld [vmem:[%s804_s1 + $0x38] sm:$0xff]  ;;  %v720_v17 = vand.u32 127, %v176_v15  ;;  %s743_s28 = sshll.u32 %s340_s19, 4  ;;  %s345_s28 = int_to_ptr.hbm [resolvable:$true] %s743_s28 }
  0x18   : > { %505 = vset.pattern.permute.xlu0 %v604_v2  ;;  %s174_s5 = scalar_lea.vmem %s803_s0, %s444_s29  ;;  %v453_v11 = vld [vmem:[%s804_s1 + $0x48] sm:$0xff]  ;;  %v455_v12 = vld [vmem:[%s804_s1 + $0x58] sm:$0xff]  ;;  %v454_v13 = vld [vmem:[%s804_s1 + $0x50] sm:$0xff]  ;;  %s170_s29 = scalar_lea.vmem [#allocation4], %s730_s10 }
  0x19   : > { %v686_v3 = vld [vmem:[%s174_s5] sm:$0xf]  ;;  %vm180_vm0 = vcmp.lt.s32.totalorder %v720_v17, 1  ;;  %vm186_vm1 = vcmp.ge.s32.totalorder %v720_v17, 15  ;;  %vm309_vm2 = vcmp.lt.s32.totalorder %v720_v17, 16  ;;  %s746_s30 = sshll.u32 %s170_s29, 4  ;;  %s356_s30 = int_to_ptr.vmem [resolvable:$true] %s746_s30 }
  0x1a   : > { %178 = vrot.lane.b32.xlu0 %v686_v3, %s605_s6  ;;  %v236_v30 = vperm.slane %v686_v3, 0  ;;  %v246_v36 = vperm.slane %v686_v3, 1  ;;  %v256_v38 = vperm.slane %v686_v3, 2  ;;  %v266_v41 = vperm.slane %v686_v3, 3  ;;  %s522_s5 = sshra.s32 %s345_s28, 4  ;;  %s523_s5 = int_to_ptr.hbm [resolvable:$true] %s522_s5 }
  0x1b   : > { %s524_s6 = scalar_lea.hbm %s523_s5, 1  ;;  %p529_p0 = scmp.lt.s32.totalorder %s523_s5, %s805_s2 }
  0x1c   : > { %p525_p11 = scmp.ne.s32.totalorder %s523_s5, %s524_s6  ;;  %p530_p1 = scmp.lt.s32.totalorder %s528_s9, %s524_s6 }
  0x1e   : > { %p526_p12 = pnand %p525_p11, %p665_p5  ;;  %p531_p2 = por %p530_p1, %p529_p0 }
  0x1f   : > { %233 = vperm.xlu2 %507, %v448_v4   ;;  %213 = vperm.xlu1 %506, %v446_v5  }
  0x20   : > { %p527_p13 = pneg %p526_p12 }
  0x22   : > { %193 = vperm.xlu0 %505, %v190_v6   ;;  %p532_p3 = pnand %p531_p2, %p527_p13 }
  0x27   : > { %253 = vperm.xlu2 %507, %v450_v7   ;;  %243 = vperm.xlu1 %506, %v449_v8  }
  0x2a   : > { %184 = vrot.lane.b32.xlu0 %v686_v3, %s606_s26  ;;  %s164_s26 = scalar_lea.vmem [#allocation2], %s730_s10 }
  0x2b   : > { %s741_s27 = sshll.u32 %s164_s26, 4  ;;  %s343_s27 = int_to_ptr.vmem [resolvable:$true] %s741_s27 }
  0x2f   : > { %273 = vperm.xlu2 %507, %v452_v9   ;;  %263 = vperm.xlu1 %506, %v451_v10  }
  0x32   : > { %283 = vperm.xlu0 %505, %v453_v11  }
  0x37   : > { %303 = vperm.xlu2 %507, %v455_v12   ;;  %293 = vperm.xlu1 %506, %v454_v13  }
  0x71   : > { %v224_v14 = vpop.permute.xlu2 %223 }
  0x79   : > { %v234_v18 = vpop.permute.xlu2 %233 }
  0x7a   : > { %v237_v37 = vmul.f32 %v236_v30, %v234_v18 }
  0x81   : > { %v254_v26 = vpop.permute.xlu2 %253 }
  0x82   : > { %v257_v45 = vmul.f32 %v256_v38, %v254_v26 }
  0x89   : > { %v204_v16 = vpop.permute.xlu1 %203  ;;  %v274_v46 = vpop.permute.xlu2 %273 }
  0x8c   : > { %v179_v19 = vpop.permute.xlu0 %178 }
  0x8d   : > { %v183_v20 = vsel %vm180_vm0, 0.0, %v179_v19 }
  0x8e   : > { %v206_v22 = vperm.slane %v183_v20, 1  ;;  %v216_v23 = vperm.slane %v183_v20, 2  ;;  %v196_v24 = vperm.slane %v183_v20, 0  ;;  %v226_v27 = vperm.slane %v183_v20, 3 }
  0x90   : > { %v207_v28 = vmul.f32 %v206_v22, %v204_v16  ;;  %v227_v34 = vmul.f32 %v226_v27, %v224_v14 }
  0x91   : > { %v214_v21 = vpop.permute.xlu1 %213  ;;  %v304_v63 = vpop.permute.xlu2 %303 }
  0x92   : > { %v217_v31 = vmul.f32 %v216_v23, %v214_v21 }
  0x94   : > { %v194_v25 = vpop.permute.xlu0 %193 }
  0x95   : > { %v197_v29 = vmul.f32 %v196_v24, %v194_v25 }
  0x97   : > { %v208_v32 = vadd.f32 %v207_v28, %v197_v29 }
  0x99   : > { %v244_v33 = vpop.permute.xlu1 %243  ;;  %v218_v35 = vadd.f32 %v217_v31, %v208_v32 }
  0x9a   : > { %v247_v43 = vmul.f32 %v246_v36, %v244_v33 }
  0x9b   : > { %v228_v39 = vadd.f32 %v227_v34, %v218_v35 }
  0x9c   : > { %v185_v40 = vpop.permute.xlu0 %184 }
  0x9d   : > { %v238_v42 = vadd.f32 %v237_v37, %v228_v39  ;;  %v189_v44 = vsel %vm186_vm1, 0.0, %v185_v40 }
  0x9e   : > { %v276_v48 = vperm.slane %v189_v44, 0  ;;  %v286_v54 = vperm.slane %v189_v44, 1  ;;  %v306_v58 = vperm.slane %v189_v44, 3  ;;  %v296_v59 = vperm.slane %v189_v44, 2 }
  0x9f   : > { %v248_v47 = vadd.f32 %v247_v43, %v238_v42 }
  0xa0   : > { %v277_v53 = vmul.f32 %v276_v48, %v274_v46  ;;  %v307_v1 = vmul.f32 %v306_v58, %v304_v63 }
  0xa1   : > { %v264_v49 = vpop.permute.xlu1 %263  ;;  %v258_v51 = vadd.f32 %v257_v45, %v248_v47 }
  0xa2   : > { %v267_v50 = vmul.f32 %v266_v41, %v264_v49 }
  0xa4   : > { %v268_v52 = vadd.f32 %v267_v50, %v258_v51  ;;  %v284_v55 = vpop.permute.xlu0 %283 }
  0xa5   : > { %v287_v57 = vmul.f32 %v286_v54, %v284_v55 }
  0xa6   : > { %v278_v56 = vadd.f32 %v277_v53, %v268_v52 }
  0xa8   : > { %v288_v60 = vadd.f32 %v287_v57, %v278_v56 }
  0xa9   : > { %v294_v61 = vpop.permute.xlu1 %293 }
  0xaa   : > { %v297_v62 = vmul.f32 %v296_v59, %v294_v61 }
  0xac   : > { %v298_v0 = vadd.f32 %v297_v62, %v288_v60 }
  0xae   : > { %v308_v2 = vadd.f32 %v307_v1, %v298_v0 }
  0xb0   : > { %v312_v3 = vsel %vm309_vm2, %v308_v2, 0.0 }
  0xb1   : > { %313 = vadd.xlane.f32.xlu0 %v312_v3  ;;  %v320_v4 = vmul.f32 %v312_v3, %v312_v3 }
  0xb3   : > { %321 = vadd.xlane.f32.xlu1 %v320_v4 }
 0x124   : > { %v314_v5 = vpop.xlane.xlu0 %313 }
 0x125   : > { %v316_v6 = vperm.slane %v314_v5, %v720_v17 }
 0x126   : > { %v322_v7 = vpop.xlane.xlu1 %321 }
 0x127   : > { %v324_v8 = vperm.slane %v322_v7, %v720_v17  ;;  %319 = vst.msk [vmem:[%s164_s26] sm:$0x1] %vm318_vm3, %v316_v6 }
 0x128   : > { %535 = shalt.err (!%p532_p3)
}
 0x129   : > { %458 = dma.vmem_to_hbm [thread:$0]  (%p665_p5), %s343_s27, 16, %s345_s28, %s328_s16   ;;  %326 = vst.msk [vmem:[%s170_s29] sm:$0x1] %vm318_vm3, %v324_v8 }
 0x12a   : > { %s332_s19 = scalar_lea.sflag [#allocation5], %s730_s10  ;;  %s550_s20 = sshra.s32 %s358_s4, 4  ;;  %s551_s20 = int_to_ptr.hbm [resolvable:$true] %s550_s20 }
 0x12b   : > { %s552_s24 = scalar_lea.hbm %s551_s20, 1  ;;  %s556_s5 = scalar_lea.hbm %s806_s3, 2 }
 0x12c   : > { %p553_p4 = scmp.ne.s32.totalorder %s551_s20, %s552_s24  ;;  %p557_p9 = scmp.lt.s32.totalorder %s551_s20, %s806_s3 }
 0x12d   : > { %p558_p10 = scmp.lt.s32.totalorder %s556_s5, %s552_s24 }
 0x12e   : > { %p554_p7 = pnand %p553_p4, %p665_p5 }
 0x12f   : > { %p559_p11 = por %p558_p10, %p557_p9 }
 0x130   : > { %p555_p8 = pneg %p554_p7 }
 0x132   : > { %p560_p12 = pnand %p559_p11, %p555_p8 }
 0x134   : > { %563 = shalt.err (!%p560_p12)
}
 0x135   : > { %459 = dma.vmem_to_hbm [thread:$0]  (%p665_p5), %s356_s30, 16, %s358_s4, %s332_s19  }
 0x136 PF: > { %p469_p13 = scmp.ge.s32.totalorder %s602_s15, 2  ;;  %s369_s10 = sand.u32 1, %s590_s12  }
 0x137   : > { %s370_s27 = scalar_lea.sflag [#allocation3], %s369_s10 }
 0x138   : > { %p463_p0 = pnand %p469_p13, %p669_p6 }
 0x13a   : > { %p464_p1 = pneg %p463_p0 }
 0x13c   : > { %581 = dma.done.wait (%p464_p1), %s370_s27, 16  }
 0x13d   : > { %583 = vsyncadd (%p464_p1), %s370_s27, 4294967280  ;;  %s379_s28 = scalar_lea.sflag [#allocation5], %s369_s10 }
 0x13e   : > { %585 = dma.done.wait (%p464_p1), %s379_s28, 16  }
 0x13f   : > { %587 = vsyncadd (%p464_p1), %s379_s28, 4294967280  ;;  %p17_p5 = scmp.ge.s32.totalorder %s652_s18, 4   ;;  %s809_s12 = smov %s594_s13 }
 0x140   : > { %s810_s13 = smov %s598_s14  ;;  %s811_s14 = smov %s663_s21 }
 0x141   : > { %s812_s15 = smov %s652_s18  ;;  %19 = sbr.rel (!%p17_p5) target bundleno = 5 (0x5), region = 91 }
 0x146   :  { %384 = vsyncpa [#allocation3], 1 }
 0x147   :  { %386 = vsyncpa [#allocation3 + $0x1], 1 }
 0x148   :  { %387 = vsyncpa [#allocation5], 1 }
 0x149   :  { %389 = vsyncpa [#allocation5 + $0x1], 1 }

</bundles_post_ra>
